<compile_context>
chip_gen: v5e
topology: v5e:2x2
jax: 0.10.0
libtpu: 0.0.40
codegen_flags: <defaults>
</compile_context>

<pallas_src>
import functools

import jax
import jax.numpy as jnp
from jax.experimental import pallas as pl
from jax.experimental.pallas import tpu as pltpu


def _round_up(x, m):
    return ((x + m - 1) // m) * m


def _pick_tiles(B, HW, C_in, C_out, itemsize, *,
                block_budget_bytes=20 << 20, tn_cap=65536, bb_cap=8):
    """Pick (bb, tn) = (batch block, spatial-lane block).

    Budget accounts for the double-buffered x block and double-buffered output
    block (weight/bias are tiny and resident).  tn is either the full spatial
    extent or a multiple of 128; ragged trailing blocks are handled by cdiv
    grids, so no 'tn must divide HW' requirement and no full-HW fallback.
    """
    per_bn = 2 * (C_in + C_out) * itemsize          # bytes per (batch, lane) elem
    bn_max = max(block_budget_bytes // per_bn, 128)

    if HW <= bn_max:
        tn = HW                                     # full spatial dim in one block
        bb = max(1, min(B, bb_cap, bn_max // max(HW, 1)))
    else:
        bb = 1
        tn = max(128, min(tn_cap, (bn_max // 128) * 128))

    # v7x has 2 TensorCores: avoid a (1, 1) grid when there is enough work.
    if -(-B // bb) == 1 and -(-HW // tn) == 1 and HW >= 256:
        tn = min(tn, _round_up(-(-HW // 2), 128))

    return bb, tn


def _conv1x1_kernel(x_ref, w_ref, b_ref, o_ref, *, bb):
    # x_ref: (bb, C_in, tn)   spatial in lanes
    # w_ref: (C_out, C_in)    resident across the grid
    # b_ref: (C_out, 1)       f32, resident across the grid
    # o_ref: (bb, C_out, tn)  lane-dense output tile
    w = w_ref[...]
    b = b_ref[...]
    for bi in range(bb):                            # small static unroll
        acc = jnp.dot(w, x_ref[bi],
                      preferred_element_type=jnp.float32,
                      precision=jax.lax.Precision.HIGHEST)
        o_ref[bi] = (acc + b).astype(o_ref.dtype)


@jax.jit
def last_layer_forward(x_nchw, weight, bias):
    """1x1 conv forward (== nn.Conv2d(kernel_size=1, bias=True)).

    x_nchw: (B, C_in, H, W)   PyTorch NCHW convention
    weight: (C_out, C_in)     nn.Conv2d weight squeezed from (C_out, C_in, 1, 1)
    bias:   (C_out,)
    returns (B, C_out, H, W)
    """
    B, C_in, H, W = x_nchw.shape
    C_out = weight.shape[0]
    HW = H * W

    # Free reshape, no transpose: channels in sublanes, spatial in lanes.
    x3 = x_nchw.reshape(B, C_in, HW)
    w = weight.astype(x_nchw.dtype)                 # (C_out, C_in)
    b_col = bias.reshape(C_out, 1).astype(jnp.float32)

    bb, tn = _pick_tiles(B, HW, C_in, C_out, jnp.dtype(x_nchw.dtype).itemsize)
    grid = (pl.cdiv(B, bb), pl.cdiv(HW, tn))

    itemsize = jnp.dtype(x_nchw.dtype).itemsize
    cost = pl.CostEstimate(
        flops=2 * B * C_out * C_in * HW,
        transcendentals=0,
        bytes_accessed=(B * C_in * HW * itemsize
                        + B * C_out * HW * itemsize
                        + C_out * C_in * itemsize
                        + C_out * 4),
    )

    out3 = pl.pallas_call(
        functools.partial(_conv1x1_kernel, bb=bb),
        out_shape=jax.ShapeDtypeStruct((B, C_out, HW), x_nchw.dtype),
        grid_spec=pltpu.PrefetchScalarGridSpec(
            num_scalar_prefetch=0,
            grid=grid,
            in_specs=[
                # x: bb batches, full channel dim, tn spatial lanes per step.
                pl.BlockSpec((bb, C_in, tn), lambda b, j: (b, 0, j)),
                # Full weight, resident across the grid.
                pl.BlockSpec((C_out, C_in), lambda b, j: (0, 0)),
                # Bias column, resident across the grid.
                pl.BlockSpec((C_out, 1), lambda b, j: (0, 0)),
            ],
            out_specs=pl.BlockSpec((bb, C_out, tn), lambda b, j: (b, 0, j)),
        ),
        compiler_params=pltpu.CompilerParams(
            dimension_semantics=("parallel", "parallel"),
            vmem_limit_bytes=32 << 20,              # safe on v5e/v6e/v7x
        ),
        cost_estimate=cost,
    )(x3, w, b_col)

    return out3.reshape(B, C_out, H, W)


if __name__ == "__main__":
    # Small shapes consistent with UNet5_1's out_layer = LastLayer(32, 2).
    B, C_in, C_out, Hs, Ws = 2, 32, 2, 16, 16

    key = jax.random.PRNGKey(0)
    kx, kw, kb = jax.random.split(key, 3)
    x = jax.random.normal(kx, (B, C_in, Hs, Ws), dtype=jnp.float32)
    weight = jax.random.normal(kw, (C_out, C_in), dtype=jnp.float32) * 0.1
    bias = jax.random.normal(kb, (C_out,), dtype=jnp.float32) * 0.1

    out = last_layer_forward(x, weight, bias)
    out = jax.block_until_ready(out)

    # Pure-JAX reference for the 1x1 conv (full-precision matmul).
    ref = jnp.einsum("bihw,oi->bohw", x, weight,
                     precision=jax.lax.Precision.HIGHEST) \
        + bias[None, :, None, None]
    assert out.shape == (B, C_out, Hs, Ws)
    assert jnp.allclose(out, ref, atol=1e-4, rtol=1e-5), float(
        jnp.max(jnp.abs(out - ref)))

    print("KERNEL_OK")
</pallas_src>

<mosaic_0001>
module attributes {stable_mosaic.version = 11 : i64} {
  func.func @_conv1x1_kernel(%arg0: i32, %arg1: i32, %arg2: memref<2x32x128xf32, #tpu.memory_space<vmem>>, %arg3: memref<2x32xf32, #tpu.memory_space<vmem>>, %arg4: memref<2x1xf32, #tpu.memory_space<vmem>>, %arg5: memref<2x2x128xf32, #tpu.memory_space<vmem>>) attributes {dimension_semantics = [#tpu.dimension_semantics<parallel>, #tpu.dimension_semantics<parallel>], iteration_bounds = array<i64: 1, 2>, scalar_prefetch = 0 : i64, scratch_operands = 0 : i64, tpu.core_type = #tpu.core_type<tc>, window_params = [{transform_indices = @transform_0, window_bounds = array<i64: 2, 32, 128>}, {pipeline_mode = #tpu.pipeline_mode<synchronous>, transform_indices = @transform_1, window_bounds = array<i64: 2, 32>}, {pipeline_mode = #tpu.pipeline_mode<synchronous>, transform_indices = @transform_2, window_bounds = array<i64: 2, 1>}, {transform_indices = @transform_3, window_bounds = array<i64: 2, 2, 128>}]} {
    %c0 = arith.constant 0 : index
    %c0_0 = arith.constant 0 : index
    %0 = vector.load %arg3[%c0, %c0_0] : memref<2x32xf32, #tpu.memory_space<vmem>>, vector<2x32xf32>
    %c0_1 = arith.constant 0 : index
    %c0_2 = arith.constant 0 : index
    %1 = vector.load %arg4[%c0_1, %c0_2] : memref<2x1xf32, #tpu.memory_space<vmem>>, vector<2x1xf32>
    %c0_3 = arith.constant 0 : index
    %c0_4 = arith.constant 0 : index
    %c0_5 = arith.constant 0 : index
    %2 = vector.load %arg2[%c0_3, %c0_4, %c0_5] : memref<2x32x128xf32, #tpu.memory_space<vmem>>, vector<1x32x128xf32>
    %3 = vector.shape_cast %2 : vector<1x32x128xf32> to vector<32x128xf32>
    %cst = arith.constant dense<0.000000e+00> : vector<2x128xf32>
    %4 = tpu.matmul %0, %3, %cst {dimension_numbers = #tpu.dot_dimension_numbers<[1], [0], [0], [1], [0, 0, 1, 1], [], []>, precision = #tpu.contract_precision<fp32>} : vector<2x32xf32>, vector<32x128xf32>, vector<2x128xf32> -> vector<2x128xf32>
    %5 = vector.broadcast %1 : vector<2x1xf32> to vector<2x128xf32>
    %6 = arith.addf %4, %5 : vector<2x128xf32>
    %c0_6 = arith.constant 0 : index
    %c0_7 = arith.constant 0 : index
    %c0_8 = arith.constant 0 : index
    %7 = vector.load %arg5[%c0_6, %c0_7, %c0_8] : memref<2x2x128xf32, #tpu.memory_space<vmem>>, vector<1x2x128xf32>
    %8 = vector.shape_cast %7 : vector<1x2x128xf32> to vector<2x128xf32>
    %9 = vector.shape_cast %6 : vector<2x128xf32> to vector<1x2x128xf32>
    tpu.vector_store %arg5[%c0_6, %c0_7, %c0_8], %9 {strides = array<i32>} : memref<2x2x128xf32, #tpu.memory_space<vmem>>, vector<1x2x128xf32>,
    %c1 = arith.constant 1 : index
    %c0_9 = arith.constant 0 : index
    %c0_10 = arith.constant 0 : index
    %10 = vector.load %arg2[%c1, %c0_9, %c0_10] : memref<2x32x128xf32, #tpu.memory_space<vmem>>, vector<1x32x128xf32>
    %11 = vector.shape_cast %10 : vector<1x32x128xf32> to vector<32x128xf32>
    %cst_11 = arith.constant dense<0.000000e+00> : vector<2x128xf32>
    %12 = tpu.matmul %0, %11, %cst_11 {dimension_numbers = #tpu.dot_dimension_numbers<[1], [0], [0], [1], [0, 0, 1, 1], [], []>, precision = #tpu.contract_precision<fp32>} : vector<2x32xf32>, vector<32x128xf32>, vector<2x128xf32> -> vector<2x128xf32>
    %13 = vector.broadcast %1 : vector<2x1xf32> to vector<2x128xf32>
    %14 = arith.addf %12, %13 : vector<2x128xf32>
    %c1_12 = arith.constant 1 : index
    %c0_13 = arith.constant 0 : index
    %c0_14 = arith.constant 0 : index
    %15 = vector.load %arg5[%c1_12, %c0_13, %c0_14] : memref<2x2x128xf32, #tpu.memory_space<vmem>>, vector<1x2x128xf32>
    %16 = vector.shape_cast %15 : vector<1x2x128xf32> to vector<2x128xf32>
    %17 = vector.shape_cast %14 : vector<2x128xf32> to vector<1x2x128xf32>
    tpu.vector_store %arg5[%c1_12, %c0_13, %c0_14], %17 {strides = array<i32>} : memref<2x2x128xf32, #tpu.memory_space<vmem>>, vector<1x2x128xf32>,
    return
  }
  func.func @transform_0(%arg0: i32, %arg1: i32) -> (i32, i32, i32) {
    %c0_i32 = arith.constant 0 : i32
    %c0_i32_0 = arith.constant 0 : i32
    return %arg0, %c0_i32, %arg1 : i32, i32, i32
  }
  func.func @transform_1(%arg0: i32, %arg1: i32) -> (i32, i32) {
    %c0_i32 = arith.constant 0 : i32
    %c0_i32_0 = arith.constant 0 : i32
    %c0_i32_1 = arith.constant 0 : i32
    return %c0_i32, %c0_i32_0 : i32, i32
  }
  func.func @transform_2(%arg0: i32, %arg1: i32) -> (i32, i32) {
    %c0_i32 = arith.constant 0 : i32
    %c0_i32_0 = arith.constant 0 : i32
    %c0_i32_1 = arith.constant 0 : i32
    return %c0_i32, %c0_i32_0 : i32, i32
  }
  func.func @transform_3(%arg0: i32, %arg1: i32) -> (i32, i32, i32) {
    %c0_i32 = arith.constant 0 : i32
    %c0_i32_0 = arith.constant 0 : i32
    return %arg0, %c0_i32, %arg1 : i32, i32, i32
  }
}

</mosaic_0001>

<bundles_post_ra>
// kernel: last_layer_forward.1
= control target key start
LH: loop header
LB: loop body
LE: loop exit
PB: predicated region body
PF: predicated region fallthrough
CT: control target
= control target key end

     0   :  { %s881_s12 = smov 0   ;;  %s883_s13 = smov 0   ;;  %s1041_s0 = inlined_call_operand.vmem [shape: f32[2,32,256], index: 0, kind: input, shape index: {}]   ;;  %s1042_s1 = inlined_call_operand.vmem [shape: f32[2,32], index: 1, kind: input, shape index: {}]   ;;  %s1043_s2 = inlined_call_operand.vmem [shape: f32[2,1], index: 2, kind: input, shape index: {}]   ;;  %s1044_s3 = inlined_call_operand.vmem [shape: f32[2,2,256], index: 3, kind: output, shape index: {}]  }
   0x1   :  { %s885_s14 = smov 0   ;;  %s887_s15 = smov 0  }
   0x2   :  { %s889_s16 = smov 0  }
   0x3 LB: > { %s22_s17 = sadd.s32 1, %s854_s15  ;;  %s760_s18 = sadd.s32 4294967295, %s858_s16   ;;  %s858_s16 = sphi %s889_s16, %s13_s16   ;;  %s854_s15 = sphi %s887_s15, %s1049_s15   ;;  %s850_s14 = sphi %s885_s14, %s1048_s14   ;;  %s846_s13 = sphi %s883_s13, %s1047_s13   ;;  %s842_s12 = sphi %s881_s12, %s1046_s12  }
   0x4   : > { %p23_p0 = scmp.ge.s32.totalorder %s22_s17, 2  ;;  %p41_p1 = scmp.ne.s32.totalorder %s846_s13, %s842_s12 }
   0x5   : > { %p42_p2 = scmp.eq.s32.totalorder %s858_s16, 0  ;;  %p115_p4 = scmp.eq.s32.totalorder %s760_s18, 1 }
   0x6   : > { %s1051_s17 = smov (%p23_p0, %s22_s17), 0  ;;  %s34_s20 = sadd.s32 1, %s846_s13 }
   0x7   : > { %p43_p3 = por %p42_p2, %p41_p1  ;;  %s30_s19 = ssub.s32 %s854_s15, %s1051_s17 }
   0x8   : > { %p32_p5 = scmp.eq.s32.totalorder %s30_s19, 0  ;;  %p916_p6 = por %p115_p4, %p41_p1 }
   0x9   : > { %p763_p7 = scmp.ge.s32.totalorder %s858_s16, 2 }
   0xa   : > { %s921_s22 = scalar_select %p32_p5, %s846_s13, %s34_s20  }
   0xb   : > { %143 = sbr.rel (%p763_p7) target bundleno = 28 (0x1c), region = 24 }
  0x10   : > { %146 = sbr.rel (!%p43_p3) target bundleno = 28 (0x1c), region = 28  ;;  %s148_s23 = sand.u32 (%p43_p3), 1, %s846_s13  }
  0x11   : > { %s765_s24 = sshll.u32 (%p43_p3), %s854_s15, 3  ;;  %s764_s25 = sshll.u32 (%p43_p3), %s148_s23, 6 }
  0x12   : > { %s155_s28 = scalar_lea.vmem (%p43_p3), %s1041_s0, %s765_s24  ;;  %s150_s29 = scalar_lea.vmem (%p43_p3), [#allocation2], %s764_s25 }
  0x13   : > { %v198_v0 = vld [vmem:[%s155_s28] sm:$0xff] (%p43_p3)  ;;  %v200_v1 = vld [vmem:[%s155_s28 + $0x10] sm:$0xff] (%p43_p3) }
  0x14   : > { %v202_v2 = vld [vmem:[%s155_s28 + $0x20] sm:$0xff] (%p43_p3)  ;;  %199 = vst [vmem:[%s150_s29] sm:$0xff] (%p43_p3), %v198_v0  ;;  %v204_v3 = vld [vmem:[%s155_s28 + $0x30] sm:$0xff] (%p43_p3) }
  0x15   : > { %201 = vst [vmem:[%s150_s29 + $0x8] sm:$0xff] %v200_v1  ;;  %v206_v4 = vld [vmem:[%s155_s28 + $0x40] sm:$0xff]  ;;  %v208_v5 = vld [vmem:[%s155_s28 + $0x50] sm:$0xff] }
  0x16   : > { %203 = vst [vmem:[%s150_s29 + $0x10] sm:$0xff] %v202_v2  ;;  %v210_v6 = vld [vmem:[%s155_s28 + $0x60] sm:$0xff]  ;;  %v212_v7 = vld [vmem:[%s155_s28 + $0x70] sm:$0xff] }
  0x17   : > { %205 = vst [vmem:[%s150_s29 + $0x18] sm:$0xff] %v204_v3 }
  0x18   : > { %207 = vst [vmem:[%s150_s29 + $0x20] sm:$0xff] %v206_v4 }
  0x19   : > { %209 = vst [vmem:[%s150_s29 + $0x28] sm:$0xff] %v208_v5 }
  0x1a   : > { %211 = vst [vmem:[%s150_s29 + $0x30] sm:$0xff] %v210_v6 }
  0x1b   : > { %213 = vst [vmem:[%s150_s29 + $0x38] sm:$0xff] %v212_v7 }
  0x1c PF: > { %p766_p8 = scmp.ge.s32.totalorder %s858_s16, 1  ;;  %p218_p9 = scmp.lt.s32.totalorder %s858_s16, 3 }
  0x1e   : > { %p219_p10 = pnand %p766_p8, %p218_p9 }
  0x1f   : > { %s225_s30 = sand.u32 (!%p219_p10), 1, %s842_s12  }
  0x20   : > { %222 = sbr.rel (%p219_p10) target bundleno = 214 (0xd6), region = 66  ;;  %s767_s6 = sshll.u32 (!%p219_p10), %s225_s30, 6 }
  0x21   : > { %s227_s9 = scalar_lea.vmem (!%p219_p10), [#allocation2], %s767_s6  ;;  %s768_s10 = sshll.u32 (!%p219_p10), %s225_s30, 2 }
  0x22   : > { %s246_s11 = scalar_lea.vmem (!%p219_p10), [#allocation3], %s768_s10 }
  0x25   : > { %v249_v8 = vld [vmem:[%s1042_s1] sm:$0x3]  ;;  %vm260_vm0 = vcmask 261120   ;;  %v860_v10 = vmov 0   ;;  %v254_v13 = vld [vmem:[%s227_s9 + $0x18] sm:$0xff]  ;;  %v253_v14 = vld [vmem:[%s227_s9 + $0x10] sm:$0xff] }
  0x26   : > { %v262_v9 = vsel %vm260_vm0, %v249_v8, 0  ;;  %819 = vset.pattern.permute.xlu0 %v860_v10  ;;  %v250_v11 = vld [vmem:[%s1043_s2] sm:$0x3]  ;;  %v252_v15 = vld [vmem:[%s227_s9 + $0x8] sm:$0xff]  ;;  %v942_v16 = vand.u32 4294901760, %v254_v13  ;;  %v944_v17 = vand.u32 4294901760, %v253_v14 }
  0x27   : > { %v940_v12 = vand.u32 4294901760, %v262_v9  ;;  %257 = vperm.xlu0 %819, %v250_v11   ;;  %v946_v18 = vand.u32 4294901760, %v252_v15  ;;  %v251_v19 = vld [vmem:[%s227_s9] sm:$0xff]  ;;  %v772_v21 = vld [vmem:[%s227_s9 + $0x38] sm:$0xff]  ;;  %v771_v22 = vld [vmem:[%s227_s9 + $0x30] sm:$0xff]  ;;  %s775_s12 = sshll.u32 (%p916_p6), %s850_s14, 1 }
  0x28   : > { %v951_v23 = vand.u32 4294901760, %v251_v19  ;;  %v953_v24 = vand.u32 4294901760, %v772_v21  ;;  %v955_v25 = vand.u32 4294901760, %v771_v22  ;;  %v770_v26 = vld [vmem:[%s227_s9 + $0x28] sm:$0xff]  ;;  %v306_v27 = vsub.f32 %v254_v13, %v942_v16  ;;  %277 = vmatpush.msra.mxu0 %v942_v16  ;;  %377 = vmatpush.msra.mxu3 %v942_v16  ;;  %v769_v31 = vld [vmem:[%s227_s9 + $0x20] sm:$0xff]  ;;  %s653_s20 = scalar_lea.vmem (%p916_p6), %s1044_s3, %s775_s12 }
  0x29   : > { %v949_v20 = vsub.f32 %v262_v9, %v940_v12  ;;  %v312_v28 = vsub.f32 %v253_v14, %v944_v17  ;;  %v318_v29 = vsub.f32 %v252_v15, %v946_v18  ;;  %v969_v34 = vand.u32 4294901760, %v770_v26 }
  0x2a   : > { %v324_v32 = vsub.f32 %v251_v19, %v951_v23  ;;  %v967_v33 = vsub.f32 %v772_v21, %v953_v24  ;;  %v972_v35 = vsub.f32 %v771_v22, %v955_v25  ;;  %348 = vmatpush.msra.mxu2 %v306_v27  ;;  %279 = vmatpush.msra.mxu0 %v944_v17  ;;  %v307_v36 = vand.u32 4294901760, %v306_v27 }
  0x2b   : > { %v963_v30 = vand.u32 4294901760, %v949_v20  ;;  %v313_v37 = vand.u32 4294901760, %v312_v28  ;;  %v319_v38 = vand.u32 4294901760, %v318_v29  ;;  %379 = vmatpush.msra.mxu3 %v944_v17  ;;  %v980_v43 = vand.u32 4294901760, %v769_v31 }
  0x2c   : > { %v498_v40 = vand.u32 4294901760, %v967_v33  ;;  %v325_v41 = vand.u32 4294901760, %v324_v32  ;;  %v504_v42 = vand.u32 4294901760, %v972_v35  ;;  %351 = vmatpush.msra.mxu2 %v312_v28  ;;  %v308_v44 = vsub.f32 %v306_v27, %v307_v36  ;;  %281 = vmatpush.msra.mxu0 %v946_v18 }
  0x2d   : > { %v287_v39 = vsub.f32 %v949_v20, %v963_v30  ;;  %v314_v45 = vsub.f32 %v312_v28, %v313_v37  ;;  %v320_v46 = vsub.f32 %v318_v29, %v319_v38  ;;  %381 = vmatpush.msra.mxu3 %v946_v18  ;;  %v509_v50 = vsub.f32 %v770_v26, %v969_v34 }
  0x2e   : > { %v499_v48 = vsub.f32 %v967_v33, %v498_v40  ;;  %v505_v49 = vsub.f32 %v972_v35, %v504_v42  ;;  %v309_v51 = vand.u32 4294901760, %v308_v44  ;;  %354 = vmatpush.msra.mxu2 %v318_v29  ;;  %283 = vmatpush.msra.mxu0 %v951_v23  ;;  %v326_v53 = vsub.f32 %v324_v32, %v325_v41 }
  0x2f   : > { %v288_v47 = vand.u32 4294901760, %v287_v39  ;;  %v315_v52 = vand.u32 4294901760, %v314_v45  ;;  %v515_v54 = vsub.f32 %v769_v31, %v980_v43  ;;  %383 = vmatpush.msra.mxu3 %v951_v23  ;;  %v510_v56 = vand.u32 4294901760, %v509_v50 }
  0x30   : > { %v500_v55 = vand.u32 4294901760, %v499_v48  ;;  %310 = vmatpush.msra.mxu1 %v309_v51  ;;  %357 = vmatpush.msra.mxu2 %v324_v32  ;;  %v321_v57 = vand.u32 4294901760, %v320_v46  ;;  %v506_v59 = vand.u32 4294901760, %v505_v49  ;;  %v327_v61 = vand.u32 4294901760, %v326_v53 }
  0x31   : > { %289 = vmatmul.f32.vlgmr.msra.gmra.mxu0 %v288_v47  ;;  %v516_v58 = vand.u32 4294901760, %v515_v54  ;;  %360 = vmatmul.f32.vlgmr.msra.gmra.mxu2 %v949_v20  ;;  %v511_v60 = vsub.f32 %v509_v50, %v510_v56 }
  0x32   : > { %387 = vmatmul.f32.vlgmr.msra.gmra.mxu3 %v963_v30  ;;  %316 = vmatpush.msra.mxu1 %v315_v52 }
  0x33   : > { %468 = vmatpush.msrb.mxu2 %v953_v24  ;;  %406 = vmatpush.msrb.mxu0 %v307_v36  ;;  %v517_v62 = vsub.f32 %v515_v54, %v516_v58  ;;  %v512_v63 = vand.u32 4294901760, %v511_v60 }
  0x34   : > { %501 = vmatpush.msrb.mxu3 %v500_v55  ;;  %322 = vmatpush.msra.mxu1 %v321_v57 }
  0x35   : > { %470 = vmatpush.msrb.mxu2 %v955_v25  ;;  %410 = vmatpush.msrb.mxu0 %v313_v37  ;;  %v518_v0 = vand.u32 4294901760, %v517_v62 }
  0x36   : > { %507 = vmatpush.msrb.mxu3 %v506_v59  ;;  %328 = vmatpush.msra.mxu1 %v327_v61 }
  0x37   : > { %472 = vmatpush.msrb.mxu2 %v969_v34  ;;  %330 = vmatmul.f32.vlgmr.msra.gmra.mxu1 %v940_v12 }
  0x38   : > { %414 = vmatpush.msrb.mxu0 %v319_v38  ;;  %437 = vmatpush.msrb.mxu1 %v942_v16 }
  0x39   : > { %474 = vmatpush.msrb.mxu2 %v980_v43  ;;  %513 = vmatpush.msrb.mxu3 %v512_v63 }
  0x3a   : > { %418 = vmatpush.msrb.mxu0 %v325_v41  ;;  %439 = vmatpush.msrb.mxu1 %v944_v17 }
  0x3b   : > { %480 = vmatmul.f32.vlgmr.msrb.gmra.mxu2 %v288_v47  ;;  %519 = vmatpush.msrb.mxu3 %v518_v0 }
  0x3c   : > { %597 = vmatpush.msra.mxu2 %v498_v40  ;;  %441 = vmatpush.msrb.mxu1 %v946_v18 }
  0x3d   : > { %420 = vmatmul.f32.vlgmr.msrb.gmra.mxu0 %v940_v12  ;;  %521 = vmatmul.f32.vlgmr.msrb.gmra.mxu3 %v940_v12 }
  0x3e   : > { %539 = vmatpush.msra.mxu0 %v967_v33  ;;  %443 = vmatpush.msrb.mxu1 %v951_v23 }
  0x3f   : > { %601 = vmatpush.msra.mxu2 %v504_v42  ;;  %628 = vmatpush.msra.mxu3 %v953_v24 }
  0x40   : > { %445 = vmatmul.f32.vlgmr.msrb.gmra.mxu1 %v940_v12  ;;  %542 = vmatpush.msra.mxu0 %v972_v35 }
  0x41   : > { %568 = vmatpush.msra.mxu1 %v953_v24  ;;  %605 = vmatpush.msra.mxu2 %v510_v56 }
  0x42   : > { %630 = vmatpush.msra.mxu3 %v955_v25  ;;  %545 = vmatpush.msra.mxu0 %v509_v50 }
  0x43   : > { %570 = vmatpush.msra.mxu1 %v955_v25  ;;  %609 = vmatpush.msra.mxu2 %v516_v58 }
  0x44   : > { %632 = vmatpush.msra.mxu3 %v969_v34  ;;  %548 = vmatpush.msra.mxu0 %v515_v54 }
  0x45   : > { %572 = vmatpush.msra.mxu1 %v969_v34  ;;  %611 = vmatmul.f32.vlgmr.msra.gmra.mxu2 %v940_v12 }
  0x46   : > { %634 = vmatpush.msra.mxu3 %v980_v43  ;;  %551 = vmatmul.f32.vlgmr.msra.gmra.mxu0 %v949_v20 }
  0x47   : > { %574 = vmatpush.msra.mxu1 %v980_v43  ;;  %636 = vmatmul.f32.vlgmr.msra.gmra.mxu3 %v940_v12 }
  0x48   : > { %578 = vmatmul.f32.vlgmr.msra.gmra.mxu1 %v963_v30 }
  0x99   : > { %v258_v1 = vpop.permute.xlu0 %257 }
  0xae   : > { %v290_v2 = vpop.f32.mrf.mxu0 }
  0xaf   : > { %v291_v3 = vadd.f32 %v290_v2, %v258_v1 }
  0xb4   : > { %v331_v4 = vpop.f32.mrf.mxu1  ;;  %v361_v5 = vpop.f32.mrf.mxu2 }
  0xb5   : > { %v332_v6 = vadd.f32 %v331_v4, %v291_v3  ;;  %v388_v7 = vpop.f32.mrf.mxu3 }
  0xb7   : > { %v362_v8 = vadd.f32 %v361_v5, %v332_v6 }
  0xb9   : > { %v389_v9 = vadd.f32 %v388_v7, %v362_v8 }
  0xba   : > { %v421_v10 = vpop.f32.mrf.mxu0 }
  0xbb   : > { %v422_v11 = vadd.f32 %v421_v10, %v389_v9 }
  0xbd   : > { %v446_v13 = vpop.f32.mrf.mxu1 }
  0xbe   : > { %v447_v14 = vadd.f32 %v446_v13, %v422_v11  ;;  %v481_v15 = vpop.f32.mrf.mxu2 }
  0xbf   : > { %v482_v16 = vadd.f32 %v481_v15, %v258_v1 }
  0xc0   : > { %449 = vst [vmem:[%s246_s11] sm:$0x3] %v447_v14  ;;  %v522_v12 = vpop.f32.mrf.mxu3 }
  0xc1   : > { %v523_v17 = vadd.f32 %v522_v12, %v482_v16 }
  0xc3   : > { %v552_v18 = vpop.f32.mrf.mxu0 }
  0xc4   : > { %v553_v19 = vadd.f32 %v552_v18, %v523_v17 }
  0xc5   : > { %v579_v20 = vpop.f32.mrf.mxu1 }
  0xc6   : > { %v580_v21 = vadd.f32 %v579_v20, %v553_v19 }
  0xc7   : > { %v670_v26 = vld [vmem:[%s246_s11] sm:$0x3] (%p916_p6) }
  0xc8   : > { %v612_v22 = vpop.f32.mrf.mxu2  ;;  %671 = vst [vmem:[%s653_s20] sm:$0x3] (%p916_p6), %v670_v26 }
  0xc9   : > { %v613_v23 = vadd.f32 %v612_v22, %v580_v21  ;;  %648 = sbr.rel (!%p916_p6) target bundleno = 214 (0xd6), region = 74 }
  0xca   : > { %v637_v24 = vpop.f32.mrf.mxu3 }
  0xcb   : > { %v638_v25 = vadd.f32 %v637_v24, %v613_v23 }
  0xcd   : > { %773 = vst [vmem:[%s246_s11 + $0x2] sm:$0x3] %v638_v25 }
  0xd4   : > { %v672_v27 = vld [vmem:[%s246_s11 + $0x2] sm:$0x3] }
  0xd5   : > { %673 = vst [vmem:[%s653_s20 + $0x4] sm:$0x3] %v672_v27 }
  0xd6 PF: > { %s13_s16 = sadd.s32 1, %s858_s16   ;;  %s1046_s12 = smov %s846_s13 }
  0xd7   : > { %p10_p11 = scmp.ge.s32.totalorder %s13_s16, 4   ;;  %s1047_s13 = smov %s921_s22 }
  0xd8   : > { %s1048_s14 = smov %s854_s15  ;;  %s1049_s15 = smov %s1051_s17 }
  0xd9   :  { %12 = sbr.rel (!%p10_p11) target bundleno = 3 (0x3), region = 141 }

</bundles_post_ra>
